<compile_context>
chip_gen: v7x
topology: tpu7x:2x2x1
jax: 0.10.0
libtpu: 0.0.40
codegen_flags: <defaults>
</compile_context>

<pallas_src>
import math

import numpy as np
import jax
import jax.numpy as jnp
from jax.experimental import pallas as pl
from jax.experimental.pallas import tpu as pltpu


# ----------------------- host-side constant interpolation matrices -------------------

def linear_interp_matrix(in_size, out_size):
    """F.interpolate(mode='linear', align_corners=False) as an (out, in) matrix."""
    M = np.zeros((out_size, in_size), dtype=np.float32)
    scale = in_size / out_size
    for i in range(out_size):
        x = max((i + 0.5) * scale - 0.5, 0.0)
        x0 = min(int(math.floor(x)), in_size - 1)
        x1 = min(x0 + 1, in_size - 1)
        w1 = x - x0
        M[i, x0] += 1.0 - w1
        M[i, x1] += w1
    return M


def antialias_bicubic_matrix(in_size, out_size):
    """Separable 1-D (out, in) matrix for
    F.interpolate(mode='bicubic', align_corners=False, antialias=True)."""
    A = -0.5

    def cubic(x):
        x = abs(x)
        if x < 1.0:
            return ((A + 2.0) * x - (A + 3.0)) * x * x + 1.0
        if x < 2.0:
            return (((x - 5.0) * x + 8.0) * x - 4.0) * A
        return 0.0

    scale = in_size / out_size
    support = 2.0 * scale if scale > 1.0 else 2.0
    fscale = scale if scale > 1.0 else 1.0
    M = np.zeros((out_size, in_size), dtype=np.float32)
    for i in range(out_size):
        center = (i + 0.5) * scale
        lo = max(int(math.floor(center - support + 0.5)), 0)
        hi = min(int(math.floor(center + support + 0.5)), in_size)
        ws = np.array([cubic((j + 0.5 - center) / fscale) for j in range(lo, hi)],
                      dtype=np.float64)
        ws = ws / ws.sum()
        M[i, lo:hi] = ws.astype(np.float32)
    return M


def _round_up(x, m):
    return ((x + m - 1) // m) * m


# ----------------------- XLA-side layout prep (resize + im2col) ----------------------

def bicubic_resize(images, out_size):
    """(B, C, H, W) -> (B, C, out, out), PyTorch bicubic antialias=True (f32)."""
    B, C, H, W = images.shape
    rh = jnp.asarray(antialias_bicubic_matrix(H, out_size))   # (out, H)
    rw = jnp.asarray(antialias_bicubic_matrix(W, out_size))   # (out, W)
    t = jnp.einsum('oh,bchw->bcow', rh, images)
    return jnp.einsum('pw,bcow->bcop', rw, t)


def im2col(images, patch):
    """(B, C, H, W) -> (B, N, C*P*P) with column order (c, p, q), matching Conv2d."""
    B, C, H, W = images.shape
    nh, nw = H // patch, W // patch
    x = images.reshape(B, C, nh, patch, nw, patch)
    x = x.transpose(0, 2, 4, 1, 3, 5)
    return x.reshape(B, nh * nw, C * patch * patch)


# ----------------------- the fused Pallas kernel --------------------------------------

def _fused_towers_kernel(x_ref, w_ref, b_ref, o_ref):
    """One grid step = one image through every tower.

    x_ref : (N_pad, K_tot) bf16  per-tower im2col blocks concatenated along K
                                 (CLIP block already carries the folded patch-axis
                                  linear upsample).
    w_ref : (K_tot, D_pad) bf16  per-tower patch-embed weights pre-placed into their
                                 own K range AND their own output-column range.
    b_ref : (1, D_pad)     f32   biases with the same column placement.
    o_ref : (N_pad, D_pad) f32   concatenated features (disjoint columns == concat).
    """
    o_ref[...] = (jnp.dot(x_ref[...], w_ref[...],
                          preferred_element_type=jnp.float32)
                  + b_ref[...]).astype(o_ref.dtype)


def fused_multi_tower_forward(x_cols, w_stacked, bias, n_pad, d_pad):
    B, _, k_tot = x_cols.shape
    return pl.pallas_call(
        _fused_towers_kernel,
        out_shape=jax.ShapeDtypeStruct((B, n_pad, d_pad), jnp.float32),
        grid=(B,),
        in_specs=[
            pl.BlockSpec((None, n_pad, k_tot), lambda i: (i, 0, 0)),
            pl.BlockSpec((k_tot, d_pad), lambda i: (0, 0)),
            pl.BlockSpec((1, d_pad), lambda i: (0, 0)),
        ],
        out_specs=pl.BlockSpec((None, n_pad, d_pad), lambda i: (i, 0, 0)),
        compiler_params=pltpu.CompilerParams(dimension_semantics=("parallel",)),
    )(x_cols, w_stacked, bias)


# ----------------------- module analog -------------------------------------------------

class MultiImageEncoderVisionTowerPallas:
    """Scaled-down analog of MultiImageEncoderVisionTower ('clip' + 'siglip' towers).

    SigLIP-native image size 384 -> 16, CLIP-native 336 -> 12, patch 14 -> 4.  Each
    tower is its ViT patch-embedding projection.  forward(): conditional bicubic
    resize for CLIP, per-tower features, patch-axis upsample to max_patches, concat
    along dim=-1 -- all matmul work fused into ONE Pallas kernel (single MXU op/image).
    """

    def __init__(self, vision_tower_name, key, channels=3,
                 siglip_image_size=16, clip_image_size=12, patch_size=4,
                 clip_hidden=32, siglip_hidden=48):
        self.vision_tower_name = vision_tower_name
        self.channels = channels
        self.siglip_image_size = siglip_image_size
        self.clip_image_size = clip_image_size
        self.patch_size = patch_size

        towers = []
        k = key
        if "clip" in vision_tower_name:
            k, kw, kb = jax.random.split(k, 3)
            towers.append(("clip", self._make_tower(kw, kb, clip_hidden)))
        if "siglip" in vision_tower_name:
            k, kw, kb = jax.random.split(k, 3)
            towers.append(("siglip", self._make_tower(kw, kb, siglip_hidden)))
        if not towers:
            raise RuntimeError("No vision tower was initialized!")
        self.towers = dict(towers)
        self.tower_order = [name for name, _ in towers]          # torch concat order
        self._hidden_size = sum(t["hidden_size"] for _, t in towers)

        # Pre-place each tower's weight into its own K range (row block) and its own
        # slice of the padded concat feature dim (column block) of one stacked slab.
        K = channels * patch_size * patch_size
        self.k_in = K
        self.k_pad = _round_up(K, 128)
        self.d_pad = _round_up(self._hidden_size, 128)
        self.k_tot = len(self.tower_order) * self.k_pad

        w_slab = np.zeros((self.k_tot, self.d_pad), np.float32)
        b_slab = np.zeros((1, self.d_pad), np.float32)
        col = 0
        for ti, name in enumerate(self.tower_order):
            t = self.towers[name]
            D = t["hidden_size"]
            w2d = np.asarray(t["weight"]).reshape(D, K).T        # (K, D)
            r0 = ti * self.k_pad
            w_slab[r0:r0 + K, col:col + D] = w2d
            b_slab[0, col:col + D] = np.asarray(t["bias"])
            col += D
        self.w_stacked = jnp.asarray(w_slab).astype(jnp.bfloat16)
        self.b_stacked = jnp.asarray(b_slab)                     # f32

    def _make_tower(self, kw, kb, hidden):
        C, P = self.channels, self.patch_size
        fan_in = C * P * P
        return {
            "weight": jax.random.normal(kw, (hidden, C, P, P), jnp.float32)
                      / math.sqrt(fan_in),
            "bias": jax.random.normal(kb, (hidden,), jnp.float32) * 0.01,
            "hidden_size": hidden,
        }

    @property
    def hidden_size(self):
        return self._hidden_size

    def _tower_images(self, name, images):
        if name == "clip" and images.shape[-1] == self.siglip_image_size:
            # analog of the 384 -> 336 antialiased-bicubic resize branch
            return bicubic_resize(images, self.clip_image_size)
        return images

    def __call__(self, images):
        B = images.shape[0]
        P = self.patch_size

        per_tower = []
        for name in self.tower_order:
            imgs = self._tower_images(name, images)
            n_patches = (imgs.shape[2] // P) * (imgs.shape[3] // P)
            per_tower.append((name, imgs, n_patches))

        max_patches = max(n for _, _, n in per_tower)
        n_pad = _round_up(max_patches, 8)

        # Build one (B, n_pad, n_towers*k_pad) bf16 operand; the patch-axis linear
        # upsample is folded into the im2col block (it commutes with X @ W + b because
        # its rows sum to 1), so the kernel is a single matmul + bias per image.
        blocks = []
        for name, imgs, n_patches in per_tower:
            x = im2col(imgs, P)                                   # (B, n_patches, K) f32
            if n_patches < max_patches:
                m = jnp.asarray(linear_interp_matrix(n_patches, max_patches))
                x = jnp.einsum('mn,bnk->bmk', m, x)               # (B, max_patches, K)
            x = jnp.pad(x, ((0, 0), (0, n_pad - x.shape[1]),
                            (0, self.k_pad - x.shape[-1])))
            blocks.append(x)
        x_cols = jnp.concatenate(blocks, axis=-1).astype(jnp.bfloat16)

        out = fused_multi_tower_forward(x_cols, self.w_stacked, self.b_stacked,
                                        n_pad, self.d_pad)
        return out[:, :max_patches, :self._hidden_size]


# ----------------------- pure-JAX f32 reference (for correctness check) ---------------

def reference_forward(module, images):
    P = module.patch_size
    feats = []
    for name in module.tower_order:
        t = module.towers[name]
        imgs = module._tower_images(name, images)
        x = im2col(imgs, P)
        w = t["weight"].reshape(t["hidden_size"], -1).T
        feats.append(jnp.einsum('bnk,kd->bnd', x, w) + t["bias"])
    max_patches = max(f.shape[1] for f in feats)
    resized = []
    for f in feats:
        if f.shape[1] < max_patches:
            m = jnp.asarray(linear_interp_matrix(f.shape[1], max_patches))
            f = jnp.einsum('mn,bnd->bmd', m, f)
        resized.append(f)
    return jnp.concatenate(resized, axis=-1)


# ----------------------- main ----------------------------------------------------------

if __name__ == "__main__":
    key = jax.random.PRNGKey(0)
    k_img, k_params = jax.random.split(key)

    B, C, H, W = 2, 3, 16, 16      # images at the SigLIP-native (384-analog) size
    images = jax.random.normal(k_img, (B, C, H, W), jnp.float32)

    tower = MultiImageEncoderVisionTowerPallas("clip_siglip", k_params, channels=C)

    fwd = jax.jit(tower.__call__)
    out = jax.block_until_ready(fwd(images))

    # clip: (16 -> 12)/4 -> 3x3 = 9 patches upsampled to 16; siglip: 4x4 = 16 patches.
    expected = (B, (H // tower.patch_size) ** 2, tower.hidden_size)
    assert out.shape == expected, (out.shape, expected)
    assert bool(jnp.all(jnp.isfinite(out)))

    ref = reference_forward(tower, images)
    max_err = float(jnp.max(jnp.abs(out - ref)))
    assert max_err < 0.05, f"max abs error vs f32 reference: {max_err}"

    print("KERNEL_OK")
</pallas_src>

<mosaic_0001>
module attributes {stable_mosaic.version = 11 : i64} {
  func.func @_fused_towers_kernel(%arg0: i32, %arg1: memref<1x16x256xbf16, #tpu.memory_space<vmem>>, %arg2: memref<256x128xbf16, #tpu.memory_space<vmem>>, %arg3: memref<1x128xf32, #tpu.memory_space<vmem>>, %arg4: memref<1x16x128xf32, #tpu.memory_space<vmem>>) attributes {dimension_semantics = [#tpu.dimension_semantics<parallel>], iteration_bounds = array<i64: 2>, scalar_prefetch = 0 : i64, scratch_operands = 0 : i64, tpu.core_type = #tpu.core_type<tc>, window_params = [{transform_indices = @transform_0, window_bounds = array<i64: 1, 16, 256>}, {pipeline_mode = #tpu.pipeline_mode<synchronous>, transform_indices = @transform_1, window_bounds = array<i64: 256, 128>}, {pipeline_mode = #tpu.pipeline_mode<synchronous>, transform_indices = @transform_2, window_bounds = array<i64: 1, 128>}, {transform_indices = @transform_3, window_bounds = array<i64: 1, 16, 128>}]} {
    %c0 = arith.constant 0 : index
    %c0_0 = arith.constant 0 : index
    %c0_1 = arith.constant 0 : index
    %0 = vector.load %arg1[%c0, %c0_0, %c0_1] : memref<1x16x256xbf16, #tpu.memory_space<vmem>>, vector<1x16x256xbf16>
    %1 = vector.shape_cast %0 : vector<1x16x256xbf16> to vector<16x256xbf16>
    %c0_2 = arith.constant 0 : index
    %c0_3 = arith.constant 0 : index
    %2 = vector.load %arg2[%c0_2, %c0_3] : memref<256x128xbf16, #tpu.memory_space<vmem>>, vector<256x128xbf16>
    %cst = arith.constant dense<0.000000e+00> : vector<16x128xf32>
    %3 = tpu.matmul %1, %2, %cst {dimension_numbers = #tpu.dot_dimension_numbers<[1], [0], [0], [1], [0, 0, 1, 1], [], []>} : vector<16x256xbf16>, vector<256x128xbf16>, vector<16x128xf32> -> vector<16x128xf32>
    %c0_4 = arith.constant 0 : index
    %c0_5 = arith.constant 0 : index
    %4 = vector.load %arg3[%c0_4, %c0_5] : memref<1x128xf32, #tpu.memory_space<vmem>>, vector<1x128xf32>
    %5 = vector.broadcast %4 : vector<1x128xf32> to vector<16x128xf32>
    %6 = arith.addf %3, %5 : vector<16x128xf32>
    %c0_6 = arith.constant 0 : index
    %c0_7 = arith.constant 0 : index
    %c0_8 = arith.constant 0 : index
    %7 = vector.load %arg4[%c0_6, %c0_7, %c0_8] : memref<1x16x128xf32, #tpu.memory_space<vmem>>, vector<1x16x128xf32>
    %8 = vector.shape_cast %7 : vector<1x16x128xf32> to vector<16x128xf32>
    %9 = vector.shape_cast %6 : vector<16x128xf32> to vector<1x16x128xf32>
    tpu.vector_store %arg4[%c0_6, %c0_7, %c0_8], %9 {strides = array<i32>} : memref<1x16x128xf32, #tpu.memory_space<vmem>>, vector<1x16x128xf32>,
    return
  }
  func.func @transform_0(%arg0: i32) -> (i32, i32, i32) {
    %c0_i32 = arith.constant 0 : i32
    %c0_i32_0 = arith.constant 0 : i32
    %c0_i32_1 = arith.constant 0 : i32
    return %arg0, %c0_i32, %c0_i32_0 : i32, i32, i32
  }
  func.func @transform_1(%arg0: i32) -> (i32, i32) {
    %c0_i32 = arith.constant 0 : i32
    %c0_i32_0 = arith.constant 0 : i32
    %c0_i32_1 = arith.constant 0 : i32
    return %c0_i32, %c0_i32_0 : i32, i32
  }
  func.func @transform_2(%arg0: i32) -> (i32, i32) {
    %c0_i32 = arith.constant 0 : i32
    %c0_i32_0 = arith.constant 0 : i32
    %c0_i32_1 = arith.constant 0 : i32
    return %c0_i32, %c0_i32_0 : i32, i32
  }
  func.func @transform_3(%arg0: i32) -> (i32, i32, i32) {
    %c0_i32 = arith.constant 0 : i32
    %c0_i32_0 = arith.constant 0 : i32
    %c0_i32_1 = arith.constant 0 : i32
    return %arg0, %c0_i32, %c0_i32_0 : i32, i32, i32
  }
}

</mosaic_0001>

<bundles_post_ra>
// kernel: a_call__.1
= control target key start
LH: loop header
LB: loop body
LE: loop exit
PB: predicated region body
PF: predicated region fallthrough
CT: control target
= control target key end

     0   :  { %8 = vsyncpa [#allocation3], 0  ;;  %s792_s0 = inlined_call_operand.vmem [shape: bf16[2,16,256], index: 0, kind: input, shape index: {}]   ;;  %s793_s1 = inlined_call_operand.vmem [shape: bf16[256,128], index: 1, kind: input, shape index: {}]   ;;  %s794_s2 = inlined_call_operand.vmem [shape: f32[1,128], index: 2, kind: input, shape index: {}]   ;;  %s795_s3 = inlined_call_operand.hbm [shape: f32[2,16,128], index: 3, kind: output, shape index: {}]  }
   0x1   :  { %10 = vsyncpa [#allocation3 + $0x1], 0  ;;  %s638_s12 = smov 0   ;;  %s640_s13 = smov 0  }
   0x2   :  { %s642_s14 = smov 0   ;;  %s644_s15 = smov 0  }
   0x3 LB: > { %s659_s16 = sadd.s32 4294967295, %s613_s15   ;;  %s436_s17 = sadd.s32 4294967294, %s613_s15   ;;  %s613_s15 = sphi %s644_s15, %s801_s15   ;;  %s609_s14 = sphi %s642_s14, %s800_s14   ;;  %s605_s13 = sphi %s640_s13, %s799_s13   ;;  %s601_s12 = sphi %s638_s12, %s798_s12  }
   0x4   : > { %s663_s18 = sadd.s32 1, %s613_s15   ;;  %s91_s19 = sadd.s32 1, %s609_s14 }
   0x5   : > { %s88_s20 = ssub.s32 %s613_s15, %s663_s18  ;;  %p101_p0 = scmp.ne.s32.totalorder %s609_s14, %s605_s13 }
   0x6   : > { %p89_p1 = scmp.eq.s32.totalorder %s88_s20, 0  ;;  %p102_p2 = scmp.eq.s32.totalorder %s659_s16, 1 }
   0x7   : > { %p107_p3 = scmp.ne.s32.totalorder %s605_s13, %s601_s12  ;;  %p108_p4 = scmp.eq.s32.totalorder %s436_s17, 1 }
   0x8   : > { %s674_s21 = scalar_select %p89_p1, %s609_s14, %s91_s19  }
   0x9   : > { %p676_p5 = por %p102_p2, %p101_p0  ;;  %p680_p6 = por %p108_p4, %p107_p3 }
   0xa   : > { %p439_p7 = scmp.ge.s32.totalorder %s613_s15, 1  ;;  %p140_p8 = scmp.lt.s32.totalorder %s613_s15, 3 }
   0xc   : > { %p141_p9 = pnand %p439_p7, %p140_p8 }
   0xd   : > { %v532_v0 = vld [vmem:[%s793_s1 + $0x40] sm:$0xff] (!%p141_p9)   ;;  %v534_v2 = vld [vmem:[%s793_s1 + $0x48] sm:$0xff] (!%p141_p9)   ;;  %p164_p10 = scmp.lt.s32.totalorder (!%p141_p9), %s659_s16, 1  ;;  %v536_v4 = vld [vmem:[%s793_s1 + $0x50] sm:$0xff] (!%p141_p9)   ;;  %s161_s25 = sand.u32 (!%p141_p9), 1, %s605_s13  }
   0xe   : > { %144 = sbr.rel (%p141_p9) target bundleno = 280 (0x118), region = 32  ;;  %v533_v1 = vld [vmem:[%s793_s1] sm:$0xff] (!%p141_p9)   ;;  %469 = vmatprep.subr.bf16.mxu0 (!%p141_p9), %v532_v0  ;;  %v535_v3 = vld [vmem:[%s793_s1 + $0x8] sm:$0xff] (!%p141_p9)   ;;  %v537_v5 = vld [vmem:[%s793_s1 + $0x10] sm:$0xff] (!%p141_p9)   ;;  %s440_s26 = sshll.u32 (!%p141_p9), %s161_s25, 4 }
   0xf   : > { %470 = vmatpush3.bf16.msra.mxu0 (!%p141_p9), %v533_v1  ;;  %v538_v6 = vld [vmem:[%s793_s1 + $0x58] sm:$0xff] (!%p141_p9)   ;;  %v540_v8 = vld [vmem:[%s793_s1 + $0x60] sm:$0xff] (!%p141_p9)   ;;  %v542_v10 = vld [vmem:[%s793_s1 + $0x68] sm:$0xff] (!%p141_p9)   ;;  %s163_s30 = scalar_lea.vmem (!%p141_p9), [#allocation2], %s440_s26  ;;  %s468_s5 = sshll.u32 (!%p141_p9), %s659_s16, 8 }
  0x10   : > { %471 = vmatprep.subr.bf16.mxu0 (!%p141_p9), %v534_v2  ;;  %v539_v7 = vld [vmem:[%s793_s1 + $0x18] sm:$0xff] (!%p141_p9)   ;;  %v541_v9 = vld [vmem:[%s793_s1 + $0x20] sm:$0xff] (!%p141_p9)   ;;  %v543_v12 = vld [vmem:[%s793_s1 + $0x28] sm:$0xff] (!%p141_p9)   ;;  %s374_s4 = sshll.u32 (!%p141_p9), %s163_s30, 4  ;;  %s749_s7 = scalar_lea.hbm (!%p141_p9), %s795_s3, %s468_s5  ;;  %s744_s4 = int_to_ptr.vmem [resolvable:$true] %s374_s4 }
  0x11   : > { %v544_v13 = vld [vmem:[%s793_s1 + $0x70] sm:$0xff] (!%p141_p9)   ;;  %v546_v15 = vld [vmem:[%s793_s1 + $0x78] sm:$0xff] (!%p141_p9)   ;;  %v443_v19 = vld [vmem:[%s794_s2] ss:$0 sm:$0xff] (!%p141_p9)  ;;  %s751_s8 = scalar_lea.sflag (!%p141_p9), [#allocation3], %s161_s25 }
  0x12   : > { %v545_v14 = vld [vmem:[%s793_s1 + $0x30] sm:$0xff] (!%p141_p9)   ;;  %v547_v16 = vld [vmem:[%s793_s1 + $0x38] sm:$0xff] (!%p141_p9)  }
  0x13   : > { %472 = vmatpush3.bf16.msra.mxu0 (!%p141_p9), %v535_v3 }
  0x14   : > { %473 = vmatprep.subr.bf16.mxu0 (!%p141_p9), %v536_v4 }
  0x15   : > { %s165_s9 = scalar_select %p164_p10, %s659_s16, 1 }
  0x16   : > { %s615_s16 = smov [#allocation2]  }
  0x17   : > { %474 = vmatpush3.bf16.msra.mxu0 %v537_v5  ;;  %s467_s20 = sshll.u32 %s165_s9, 4  ;;  %s551_s9 = scalar_lea.vmem %s744_s4, 256 }
  0x18   : > { %475 = vmatprep.subr.bf16.mxu0 %v538_v6  ;;  %s168_s28 = scalar_lea.vmem %s792_s0, %s467_s20  ;;  %p552_p11 = scmp.ne.s32.totalorder %s744_s4, %s551_s9 }
  0x19   : > { %v550_v11 = vld [vmem:[%s168_s28 + $0x4] ss:$8 sps:$4 sm:$0xff]   ;;  %v548_v17 = vld [vmem:[%s168_s28] ss:$8 sps:$4 sm:$0xff]   ;;  %s555_s10 = sshll.u32 %s615_s16, 4  ;;  %s556_s10 = int_to_ptr.vmem [resolvable:$false] %s555_s10 }
  0x1a   : > { %349 = vmatprep.mubr.bf16.mxu0 %v550_v11  ;;  %p553_p12 = pnand %p552_p11, %p676_p5  ;;  %s557_s11 = scalar_lea.vmem %s556_s10, 512 }
  0x1b   : > { %476 = vmatpush3.bf16.msra.mxu0 %v539_v7  ;;  %p558_p0 = scmp.lt.s32.totalorder %s744_s4, %s556_s10  ;;  %p559_p1 = scmp.lt.s32.totalorder %s557_s11, %s551_s9 }
  0x1c   : > { %477 = vmatprep.subr.bf16.mxu0 %v540_v8  ;;  %p554_p13 = pneg %p553_p12 }
  0x1d   : > { %p560_p2 = por %p559_p1, %p558_p0 }
  0x1f   : > { %478 = vmatpush3.bf16.msra.mxu0 %v541_v9  ;;  %p561_p3 = pnand %p560_p2, %p554_p13 }
  0x20   : > { %479 = vmatprep.subr.bf16.mxu0 %v542_v10 }
  0x23   : > { %480 = vmatpush3.bf16.msra.mxu0 %v543_v12 }
  0x24   : > { %481 = vmatprep.subr.bf16.mxu0 %v544_v13 }
  0x27   : > { %482 = vmatpush3.bf16.msra.mxu0 %v545_v14 }
  0x28   : > { %483 = vmatprep.subr.bf16.mxu0 %v546_v15 }
  0x2b   : > { %484 = vmatpush3.bf16.msra.mxu0 %v547_v16 }
  0x2e   : > { %350 = vmatmul.mubr.bf16.vlgmr.msra.gmra.mrb[0].mxu0 %v548_v17 }
 0x101   : > { %v485_v18 = vpop.f32.mrb[0].mxu0 }
 0x102   : > { %v486_v20 = vpop.f32.mrb[1].mxu0 }
 0x103   : > { %v487_v21 = vadd.f32 %v486_v20, %v485_v18  ;;  %v488_v22 = vpop.f32.mrb[2].mxu0 }
 0x104   : > { %v489_v23 = vpop.f32.mrb[3].mxu0 }
 0x105   : > { %v352_v24 = vadd.f32 %v487_v21, %v443_v19  ;;  %v490_v25 = vadd.f32 %v489_v23, %v488_v22 }
 0x107   : > { %358 = vst [vmem:[%s163_s30] sm:$0xff] %v352_v24  ;;  %v355_v26 = vadd.f32 %v490_v25, %v443_v19 }
 0x109   : > { %359 = vst [vmem:[%s163_s30 + $0x8] sm:$0xff] %v355_v26 }
 0x10a   : > { %564 = shalt.err (!%p561_p3)
}
 0x10b   : > { %s565_s17 = scalar_lea.hbm %s749_s7, 256  ;;  %s569_s24 = scalar_lea.hbm %s795_s3, 512 }
 0x10c   : > { %p566_p4 = scmp.ne.s32.totalorder %s749_s7, %s565_s17  ;;  %p570_p9 = scmp.lt.u32.totalorder %s749_s7, %s795_s3 }
 0x10d   : > { %p571_p10 = scmp.lt.u32.totalorder %s569_s24, %s565_s17  ;;  %p573_p12 = scmp.lt.u32.totalorder %s565_s17, %s749_s7 }
 0x10e   : > { %p567_p7 = pnand %p566_p4, %p676_p5 }
 0x10f   : > { %p572_p11 = por %p571_p10, %p570_p9 }
 0x110   : > { %p568_p8 = pneg %p567_p7 }
 0x111   : > { %p574_p13 = por %p573_p12, %p572_p11 }
 0x113   : > { %p575_p0 = pnand %p574_p13, %p568_p8 }
 0x115   : > { %578 = shalt.err (!%p575_p0)
}
 0x116   : > { %s616_s27 = smov 128   ;;  %s617_s29 = smov 8  }
 0x117   : > { %491 = dma.vmem_to_hbm [thread:$0]  (%p676_p5), %s744_s4, 256, %s749_s7, %s751_s8, %s616_s27, %s616_s27, %s617_s29  }
 0x118 PF: > { %p497_p1 = scmp.ge.s32.totalorder %s613_s15, 2  ;;  %s389_s30 = sand.u32 1, %s601_s12  }
 0x119   : > { %s390_s5 = scalar_lea.sflag [#allocation3], %s389_s30 }
 0x11a   : > { %p494_p2 = pnand %p497_p1, %p680_p6 }
 0x11c   : > { %596 = dma.done.wait (!%p494_p2), %s390_s5, 256  }
 0x11d   : > { %598 = vsyncadd (!%p494_p2), %s390_s5, 4294967040  ;;  %p13_p3 = scmp.ge.s32.totalorder %s663_s18, 4   ;;  %s798_s12 = smov %s605_s13 }
 0x11e   : > { %s799_s13 = smov %s609_s14  ;;  %s800_s14 = smov %s674_s21 }
 0x11f   : > { %s801_s15 = smov %s663_s18  ;;  %15 = sbr.rel (!%p13_p3) target bundleno = 3 (0x3), region = 67 }
 0x126   :  { %395 = vsyncpa [#allocation3], 1 }
 0x127   :  { %397 = vsyncpa [#allocation3 + $0x1], 1 }

</bundles_post_ra>
